<compile_context>
chip_gen: v7x
topology: tpu7x:2x2x1
jax: 0.10.0
libtpu: 0.0.40
codegen_flags: <defaults>
</compile_context>

<pallas_src>
import functools

import jax
import jax.numpy as jnp
from jax import lax
from jax.experimental import pallas as pl
from jax.experimental.pallas import tpu as pltpu

NEG_SLOPE = 0.2
BN_EPS = 1e-5
FEATURE_SIZE = 120
LANES = 128
BATCH_TILE = 32          # rows per grid step on the batch-tiled (large-batch) path

# ---- packed parameter-slab row layout (one (376, 128) f32 array, one DMA) ----
W1_OFF, W1_ROWS = 0, 48      # conv1 im2col weight, row (kh*3+kw)*5 + ci (45 real)
W2_OFF, W2_ROWS = 48, 288    # conv2 im2col weight, row (kh*3+kw)*32 + ci (ci<20 real)
WFC_OFF, WFC_ROWS = 336, 32  # fc weight, row = in-feature (30 real)
TAIL_OFF = 368               # 8-row-aligned tail block holding the vectors below
B1_ROW = 368                 # conv1 bias   (cols 0..19)
B2_ROW = 369                 # conv2 bias   (cols 0..29)
BFC_ROW = 370                # fc bias      (cols 0..119)
GAMMA_ROW = 371              # bn gamma     (cols 0..119)
BETA_ROW = 372               # bn beta      (cols 0..119)
SLAB_ROWS = 376


def _leaky(v):
    return jnp.where(v > 0, v, NEG_SLOPE * v)


# --------------------------- in-kernel compute --------------------------------
def _encode_tile(patches, slab_ref, tb):
    """conv1 -> pool -> conv2 -> pool -> fc for one batch tile.

    patches: (25*tb, 48) value, position-major (row = p*tb + b, p = h*5+w).
    Returns the pre-BatchNorm fc output, shape (tb, 128) (120 real lanes).
    """
    # conv1 (5 -> 20, 3x3, pad=1) as ONE im2col matmul + bias + leaky.
    c1 = _leaky(
        jnp.dot(patches, slab_ref[W1_OFF:W1_OFF + W1_ROWS, 0:32],
                preferred_element_type=jnp.float32)
        + slab_ref[B1_ROW:B1_ROW + 1, 0:32])                        # (25*tb, 32)

    # per-position (tb, 32) tiles (8-aligned sublane slices).
    c1t = {(h, w): c1[(h * 5 + w) * tb:(h * 5 + w + 1) * tb, :]
           for h in range(5) for w in range(5)}

    # maxpool 2x2 stride 1: 5x5 -> 4x4
    pool1 = {(h, w): jnp.maximum(jnp.maximum(c1t[(h, w)], c1t[(h, w + 1)]),
                                 jnp.maximum(c1t[(h + 1, w)], c1t[(h + 1, w + 1)]))
             for h in range(4) for w in range(4)}

    # conv2 (20 -> 30, 3x3, valid): 3 per-kh dots of shape (4*tb, 96) x (96, 32).
    # The 4 conv2 output positions are stacked on sublanes; the 3 kw activation
    # tiles are lane-concatenated (32 -> 96 lanes) so the MXU sees K=96 pushes
    # instead of 9 tiny K=32 ones (perf-review item; XLU is otherwise idle here).
    acc = jnp.zeros((4 * tb, 32), jnp.float32)
    for kh in range(3):
        cols = []
        for kw in range(3):
            cols.append(jnp.concatenate(
                [pool1[(kh, kw)], pool1[(kh, kw + 1)],
                 pool1[(kh + 1, kw)], pool1[(kh + 1, kw + 1)]], axis=0))  # (4*tb,32)
        rows96 = jnp.concatenate(cols, axis=1)                            # (4*tb,96)
        acc = acc + jnp.dot(
            rows96, slab_ref[W2_OFF + kh * 96:W2_OFF + (kh + 1) * 96, 0:32],
            preferred_element_type=jnp.float32)
    c2 = _leaky(acc + slab_ref[B2_ROW:B2_ROW + 1, 0:32])                  # (4*tb,32)

    # maxpool 2x2 stride 1 on the 2x2 grid -> (tb, 32) feature tile.
    feat = jnp.maximum(jnp.maximum(c2[0:tb], c2[tb:2 * tb]),
                       jnp.maximum(c2[2 * tb:3 * tb], c2[3 * tb:4 * tb]))

    # fc1 (30 -> feature_size), lane-dense at width 128 (unmasked stores).
    return (jnp.dot(feat, slab_ref[WFC_OFF:WFC_OFF + WFC_ROWS, :],
                    preferred_element_type=jnp.float32)
            + slab_ref[BFC_ROW:BFC_ROW + 1, :])                           # (tb,128)


def _fused_kernel(batch_ref, patches_ref, slab_ref, out_ref):
    """Small-batch path: whole forward incl. BatchNorm in one grid step."""
    tb = out_ref.shape[0]
    y = _encode_tile(patches_ref[...], slab_ref, tb)
    # BatchNorm1d, train-mode batch statistics over the REAL batch rows only.
    n = batch_ref[0]
    valid = (lax.broadcasted_iota(jnp.int32, y.shape, 0) < n).astype(jnp.float32)
    inv_n = 1.0 / n.astype(jnp.float32)
    mean = jnp.sum(y * valid, axis=0, keepdims=True) * inv_n
    var = jnp.sum(jnp.square(y - mean) * valid, axis=0, keepdims=True) * inv_n
    y_hat = (y - mean) * lax.rsqrt(var + BN_EPS)
    out_ref[...] = _leaky(y_hat * slab_ref[GAMMA_ROW:GAMMA_ROW + 1, :]
                          + slab_ref[BETA_ROW:BETA_ROW + 1, :])
    # TODO(synk): BatchNorm running_mean/running_var buffer updates (in-place
    # training side effect) are not part of the functional forward output.


def _encode_pass1_kernel(batch_ref, patches_ref, slab_ref, y_ref, stats_ref):
    """Large-batch pass 1: per-tile conv/fc + BN partial (sum, sum^2)."""
    tb = y_ref.shape[0]
    y = _encode_tile(patches_ref[...], slab_ref, tb)
    y_ref[...] = y
    n = batch_ref[0]
    gid = pl.program_id(0) * tb + lax.broadcasted_iota(jnp.int32, y.shape, 0)
    valid = (gid < n).astype(jnp.float32)
    yv = y * valid
    s = jnp.sum(yv, axis=0, keepdims=True)        # (1, 128)
    ss = jnp.sum(yv * y, axis=0, keepdims=True)   # (1, 128)
    rid = lax.broadcasted_iota(jnp.int32, stats_ref.shape, 0)
    stats_ref[...] = jnp.where(rid == 0, s, 0.0) + jnp.where(rid == 1, ss, 0.0)


def _bn_pass2_kernel(batch_ref, y_ref, tot_ref, tail_ref, out_ref):
    """Large-batch pass 2: BatchNorm (from reduced stats) + leaky."""
    inv_n = 1.0 / batch_ref[0].astype(jnp.float32)
    mean = tot_ref[0:1, :] * inv_n
    var = jnp.maximum(tot_ref[1:2, :] * inv_n - mean * mean, 0.0)
    y_hat = (y_ref[...] - mean) * lax.rsqrt(var + BN_EPS)
    out_ref[...] = _leaky(
        y_hat * tail_ref[GAMMA_ROW - TAIL_OFF:GAMMA_ROW - TAIL_OFF + 1, :]
        + tail_ref[BETA_ROW - TAIL_OFF:BETA_ROW - TAIL_OFF + 1, :])


# ------------------------------ wrapper side ----------------------------------
def _pad2(a, rows, cols=LANES):
    return jnp.pad(a, ((0, rows - a.shape[0]), (0, cols - a.shape[1])))


def _vrow(v):
    return jnp.pad(v, (0, LANES - v.shape[0]))[None, :]


def pack_params(params):
    """Pack all weights/biases into ONE (376,128) f32 slab (single DMA).

    Call this once when parameters are created/updated and pass the cached
    slab into actor_encoder_forward (perf review: do NOT rebuild per forward).
    """
    w1col = _pad2(jnp.transpose(params["w1"], (2, 3, 1, 0)).reshape(45, 20), W1_ROWS)
    w2t = jnp.pad(jnp.transpose(params["w2"], (2, 3, 1, 0)),       # (3,3,20,30)
                  ((0, 0), (0, 0), (0, 12), (0, LANES - 30)))      # (3,3,32,128)
    w2col = w2t.reshape(W2_ROWS, LANES)
    wfcp = _pad2(jnp.transpose(params["wfc"]), WFC_ROWS)           # (32, 128)
    tail = jnp.concatenate(
        [_vrow(params["b1"]), _vrow(params["b2"]), _vrow(params["bfc"]),
         _vrow(params["gamma"]), _vrow(params["beta"]),
         jnp.zeros((SLAB_ROWS - BETA_ROW - 1, LANES), jnp.float32)], axis=0)
    return jnp.concatenate([w1col, w2col, wfcp, tail], axis=0).astype(jnp.float32)
    # TODO(synk): the W2 block only uses lanes 0:32; packing 4 taps per 128
    # lanes would halve the slab but conflicts with the merged per-kh K=96
    # contiguous-row reads, so it is left lane-sparse (sub-us difference).


def _im2col_patches(state, b_pad, nb, tile):
    """(B,125) -> (nb*25*tile, 48) conv1 patch matrix, tile-major / position-major."""
    B = state.shape[0]
    x = state.reshape(B, 5, 5, 5)                      # NCHW, same as torch .view
    x = jnp.transpose(x, (0, 2, 3, 1))                 # (B,5,5,5) NHWC
    x = jnp.pad(x, ((0, b_pad - B), (1, 1), (1, 1), (0, 0)))        # pad=1 -> (b_pad,7,7,5)
    taps = [x[:, kh:kh + 5, kw:kw + 5, :] for kh in range(3) for kw in range(3)]
    patches = jnp.stack(taps, axis=3).reshape(b_pad, 25, 45)        # col=(kh*3+kw)*5+ci
    patches = jnp.pad(patches, ((0, 0), (0, 0), (0, 3)))            # K: 45 -> 48
    patches = patches.reshape(nb, tile, 25, 48).transpose(0, 2, 1, 3)
    return patches.reshape(nb * 25 * tile, 48)
    # TODO(synk): long-term, assemble the patches inside the kernel from the
    # raw (b_pad,128) state to remove this HBM roundtrip entirely.


def _spec2(shape):
    return pl.BlockSpec(shape, lambda i, b: (0, 0))


def _cost(rows):
    flops = 2 * rows * (25 * 48 * 32 + 4 * 288 * 32 + 32 * LANES)
    bytes_accessed = 4 * (25 * rows * 48 + SLAB_ROWS * LANES + rows * LANES)
    return pl.CostEstimate(flops=flops, transcendentals=LANES,
                           bytes_accessed=bytes_accessed)


_MOSAIC = dict(vmem_limit_bytes=32 * 1024 * 1024)


@functools.partial(jax.jit, static_argnames="feature_size")
def actor_encoder_forward(state, slab, feature_size=FEATURE_SIZE):
    """state: (B, 125) f32; slab: pack_params(params). Returns (B, feature_size)."""
    B = state.shape[0]
    assert feature_size <= LANES, "feature_size > 128 would need a wider slab/output"
    batch = jnp.array([B], jnp.int32)          # scalar-prefetch (SMEM) operand

    if B <= BATCH_TILE:
        # -------- small batch: one fully fused kernel, grid=(1,) -------------
        b_pad = max(8, int(pl.next_power_of_2(B)))      # bucketed -> few recompiles
        patches = _im2col_patches(state, b_pad, 1, b_pad)
        out = pl.pallas_call(
            _fused_kernel,
            out_shape=jax.ShapeDtypeStruct((b_pad, LANES), jnp.float32),
            grid_spec=pltpu.PrefetchScalarGridSpec(
                num_scalar_prefetch=1, grid=(1,),
                in_specs=[_spec2(patches.shape), _spec2((SLAB_ROWS, LANES))],
                out_specs=_spec2((b_pad, LANES))),
            compiler_params=pltpu.CompilerParams(
                dimension_semantics=("arbitrary",), **_MOSAIC),
            cost_estimate=_cost(b_pad),
        )(batch, patches, slab)
    else:
        # -------- large batch: batch-tiled "parallel" grid, 2 passes ----------
        tile = BATCH_TILE
        b_pad = ((B + 63) // 64) * 64                   # bucketed -> few recompiles
        nb = b_pad // tile

        patches = _im2col_patches(state, b_pad, nb, tile)
        y, stats = pl.pallas_call(
            _encode_pass1_kernel,
            out_shape=(jax.ShapeDtypeStruct((b_pad, LANES), jnp.float32),
                       jax.ShapeDtypeStruct((nb * 8, LANES), jnp.float32)),
            grid_spec=pltpu.PrefetchScalarGridSpec(
                num_scalar_prefetch=1, grid=(nb,),
                in_specs=[pl.BlockSpec((25 * tile, 48), lambda i, b: (i, 0)),
                          _spec2((SLAB_ROWS, LANES))],   # slab stays VMEM-resident
                out_specs=[pl.BlockSpec((tile, LANES), lambda i, b: (i, 0)),
                           pl.BlockSpec((8, LANES), lambda i, b: (i, 0))]),
            compiler_params=pltpu.CompilerParams(
                dimension_semantics=("parallel",), **_MOSAIC),
            cost_estimate=_cost(b_pad),
        )(batch, patches, slab)

        totals = jnp.sum(stats.reshape(nb, 8, LANES), axis=0)   # row0=sum, row1=sum^2

        out = pl.pallas_call(
            _bn_pass2_kernel,
            out_shape=jax.ShapeDtypeStruct((b_pad, LANES), jnp.float32),
            grid_spec=pltpu.PrefetchScalarGridSpec(
                num_scalar_prefetch=1, grid=(nb,),
                in_specs=[pl.BlockSpec((tile, LANES), lambda i, b: (i, 0)),
                          pl.BlockSpec((8, LANES), lambda i, b: (0, 0)),
                          pl.BlockSpec((8, LANES), lambda i, b: (TAIL_OFF // 8, 0))],
                out_specs=pl.BlockSpec((tile, LANES), lambda i, b: (i, 0))),
            compiler_params=pltpu.CompilerParams(
                dimension_semantics=("parallel",), **_MOSAIC),
        )(batch, y, totals, slab)

    return out[:B, :feature_size]


# ---------------- pure-JAX reference (for correctness check) -----------------
def ref_forward(state, params):
    B = state.shape[0]
    x = state.reshape(B, 5, 5, 5)
    y1 = lax.conv_general_dilated(x, params["w1"], (1, 1), ((1, 1), (1, 1)),
                                  dimension_numbers=("NCHW", "OIHW", "NCHW"))
    y1 = _leaky(y1 + params["b1"][None, :, None, None])
    p1 = jnp.maximum(jnp.maximum(y1[:, :, 0:4, 0:4], y1[:, :, 0:4, 1:5]),
                     jnp.maximum(y1[:, :, 1:5, 0:4], y1[:, :, 1:5, 1:5]))
    y2 = lax.conv_general_dilated(p1, params["w2"], (1, 1), "VALID",
                                  dimension_numbers=("NCHW", "OIHW", "NCHW"))
    y2 = _leaky(y2 + params["b2"][None, :, None, None])
    p2 = jnp.maximum(jnp.maximum(y2[:, :, 0:1, 0:1], y2[:, :, 0:1, 1:2]),
                     jnp.maximum(y2[:, :, 1:2, 0:1], y2[:, :, 1:2, 1:2]))
    f = p2.reshape(B, 30)
    y = f @ jnp.transpose(params["wfc"]) + params["bfc"]
    mean = jnp.mean(y, axis=0, keepdims=True)
    var = jnp.mean(jnp.square(y - mean), axis=0, keepdims=True)
    z = (y - mean) / jnp.sqrt(var + BN_EPS) * params["gamma"] + params["beta"]
    return _leaky(z)


if __name__ == "__main__":
    F_ = FEATURE_SIZE
    key = jax.random.PRNGKey(0)
    ks = jax.random.split(key, 10)
    params = dict(
        w1=0.2 * jax.random.normal(ks[0], (20, 5, 3, 3), jnp.float32),
        b1=0.1 * jax.random.normal(ks[1], (20,), jnp.float32),
        w2=0.1 * jax.random.normal(ks[2], (30, 20, 3, 3), jnp.float32),
        b2=0.1 * jax.random.normal(ks[3], (30,), jnp.float32),
        wfc=0.2 * jax.random.normal(ks[4], (F_, 30), jnp.float32),
        bfc=0.1 * jax.random.normal(ks[5], (F_,), jnp.float32),
        gamma=1.0 + 0.1 * jax.random.normal(ks[6], (F_,), jnp.float32),
        beta=0.1 * jax.random.normal(ks[7], (F_,), jnp.float32),
    )
    slab = jax.block_until_ready(pack_params(params))   # built ONCE, reused

    # B=4 exercises the fused single-tile path; B=80 the batch-tiled 2-pass path.
    for B, kseed in ((4, ks[8]), (80, ks[9])):
        state = jax.random.normal(kseed, (B, 125), jnp.float32)
        out = jax.block_until_ready(actor_encoder_forward(state, slab, feature_size=F_))
        ref = jax.block_until_ready(ref_forward(state, params))
        assert out.shape == (B, F_), out.shape
        max_err = float(jnp.max(jnp.abs(out - ref)))
        if max_err > 2e-3:
            raise AssertionError(f"B={B}: Pallas kernel mismatch vs ref, max_err={max_err}")
    print("KERNEL_OK")
</pallas_src>

<mosaic_0001>
module attributes {stable_mosaic.version = 11 : i64} {
  func.func @_fused_kernel(%arg0: i32, %arg1: memref<1xi32, #tpu.memory_space<smem>>, %arg2: memref<200x48xf32, #tpu.memory_space<vmem>>, %arg3: memref<376x128xf32, #tpu.memory_space<vmem>>, %arg4: memref<8x128xf32, #tpu.memory_space<vmem>>) attributes {dimension_semantics = [#tpu.dimension_semantics<arbitrary>], iteration_bounds = array<i64: 1>, scalar_prefetch = 1 : i64, scratch_operands = 0 : i64, tpu.core_type = #tpu.core_type<tc>, window_params = [{pipeline_mode = #tpu.pipeline_mode<synchronous>, transform_indices = @transform_0, window_bounds = array<i64: 200, 48>}, {pipeline_mode = #tpu.pipeline_mode<synchronous>, transform_indices = @transform_1, window_bounds = array<i64: 376, 128>}, {pipeline_mode = #tpu.pipeline_mode<synchronous>, transform_indices = @transform_2, window_bounds = array<i64: 8, 128>}]} {
    %c0 = arith.constant 0 : index
    %c0_0 = arith.constant 0 : index
    %0 = vector.load %arg2[%c0, %c0_0] : memref<200x48xf32, #tpu.memory_space<vmem>>, vector<200x48xf32>
    %c0_1 = arith.constant 0 : index
    %c0_2 = arith.constant 0 : index
    %1 = vector.load %arg3[%c0_1, %c0_2] : memref<376x128xf32, #tpu.memory_space<vmem>>, vector<48x32xf32>
    %cst = arith.constant dense<0.000000e+00> : vector<200x32xf32>
    %2 = tpu.matmul %0, %1, %cst {dimension_numbers = #tpu.dot_dimension_numbers<[1], [0], [0], [1], [0, 0, 1, 1], [], []>} : vector<200x48xf32>, vector<48x32xf32>, vector<200x32xf32> -> vector<200x32xf32>
    %c368 = arith.constant 368 : index
    %c0_3 = arith.constant 0 : index
    %3 = vector.load %arg3[%c368, %c0_3] : memref<376x128xf32, #tpu.memory_space<vmem>>, vector<1x32xf32>
    %4 = vector.broadcast %3 : vector<1x32xf32> to vector<200x32xf32>
    %5 = arith.addf %2, %4 : vector<200x32xf32>
    %cst_4 = arith.constant 0.000000e+00 : f32
    %6 = vector.broadcast %cst_4 : f32 to vector<200x32xf32>
    %7 = arith.cmpf ogt, %5, %6 : vector<200x32xf32>
    %cst_5 = arith.constant 2.000000e-01 : f32
    %8 = vector.broadcast %cst_5 : f32 to vector<200x32xf32>
    %9 = arith.mulf %8, %5 : vector<200x32xf32>
    %10 = arith.select %7, %5, %9 : vector<200x32xi1>, vector<200x32xf32>
    %11 = vector.extract_strided_slice %10 {offsets = [0, 0], sizes = [8, 32], strides = [1, 1]} : vector<200x32xf32> to vector<8x32xf32>
    %12 = vector.extract_strided_slice %10 {offsets = [8, 0], sizes = [8, 32], strides = [1, 1]} : vector<200x32xf32> to vector<8x32xf32>
    %13 = vector.extract_strided_slice %10 {offsets = [16, 0], sizes = [8, 32], strides = [1, 1]} : vector<200x32xf32> to vector<8x32xf32>
    %14 = vector.extract_strided_slice %10 {offsets = [24, 0], sizes = [8, 32], strides = [1, 1]} : vector<200x32xf32> to vector<8x32xf32>
    %15 = vector.extract_strided_slice %10 {offsets = [32, 0], sizes = [8, 32], strides = [1, 1]} : vector<200x32xf32> to vector<8x32xf32>
    %16 = vector.extract_strided_slice %10 {offsets = [40, 0], sizes = [8, 32], strides = [1, 1]} : vector<200x32xf32> to vector<8x32xf32>
    %17 = vector.extract_strided_slice %10 {offsets = [48, 0], sizes = [8, 32], strides = [1, 1]} : vector<200x32xf32> to vector<8x32xf32>
    %18 = vector.extract_strided_slice %10 {offsets = [56, 0], sizes = [8, 32], strides = [1, 1]} : vector<200x32xf32> to vector<8x32xf32>
    %19 = vector.extract_strided_slice %10 {offsets = [64, 0], sizes = [8, 32], strides = [1, 1]} : vector<200x32xf32> to vector<8x32xf32>
    %20 = vector.extract_strided_slice %10 {offsets = [72, 0], sizes = [8, 32], strides = [1, 1]} : vector<200x32xf32> to vector<8x32xf32>
    %21 = vector.extract_strided_slice %10 {offsets = [80, 0], sizes = [8, 32], strides = [1, 1]} : vector<200x32xf32> to vector<8x32xf32>
    %22 = vector.extract_strided_slice %10 {offsets = [88, 0], sizes = [8, 32], strides = [1, 1]} : vector<200x32xf32> to vector<8x32xf32>
    %23 = vector.extract_strided_slice %10 {offsets = [96, 0], sizes = [8, 32], strides = [1, 1]} : vector<200x32xf32> to vector<8x32xf32>
    %24 = vector.extract_strided_slice %10 {offsets = [104, 0], sizes = [8, 32], strides = [1, 1]} : vector<200x32xf32> to vector<8x32xf32>
    %25 = vector.extract_strided_slice %10 {offsets = [112, 0], sizes = [8, 32], strides = [1, 1]} : vector<200x32xf32> to vector<8x32xf32>
    %26 = vector.extract_strided_slice %10 {offsets = [120, 0], sizes = [8, 32], strides = [1, 1]} : vector<200x32xf32> to vector<8x32xf32>
    %27 = vector.extract_strided_slice %10 {offsets = [128, 0], sizes = [8, 32], strides = [1, 1]} : vector<200x32xf32> to vector<8x32xf32>
    %28 = vector.extract_strided_slice %10 {offsets = [136, 0], sizes = [8, 32], strides = [1, 1]} : vector<200x32xf32> to vector<8x32xf32>
    %29 = vector.extract_strided_slice %10 {offsets = [144, 0], sizes = [8, 32], strides = [1, 1]} : vector<200x32xf32> to vector<8x32xf32>
    %30 = vector.extract_strided_slice %10 {offsets = [152, 0], sizes = [8, 32], strides = [1, 1]} : vector<200x32xf32> to vector<8x32xf32>
    %31 = vector.extract_strided_slice %10 {offsets = [160, 0], sizes = [8, 32], strides = [1, 1]} : vector<200x32xf32> to vector<8x32xf32>
    %32 = vector.extract_strided_slice %10 {offsets = [168, 0], sizes = [8, 32], strides = [1, 1]} : vector<200x32xf32> to vector<8x32xf32>
    %33 = vector.extract_strided_slice %10 {offsets = [176, 0], sizes = [8, 32], strides = [1, 1]} : vector<200x32xf32> to vector<8x32xf32>
    %34 = vector.extract_strided_slice %10 {offsets = [184, 0], sizes = [8, 32], strides = [1, 1]} : vector<200x32xf32> to vector<8x32xf32>
    %35 = vector.extract_strided_slice %10 {offsets = [192, 0], sizes = [8, 32], strides = [1, 1]} : vector<200x32xf32> to vector<8x32xf32>
    %36 = arith.maximumf %11, %12 : vector<8x32xf32>
    %37 = arith.maximumf %16, %17 : vector<8x32xf32>
    %38 = arith.maximumf %36, %37 : vector<8x32xf32>
    %39 = arith.maximumf %12, %13 : vector<8x32xf32>
    %40 = arith.maximumf %17, %18 : vector<8x32xf32>
    %41 = arith.maximumf %39, %40 : vector<8x32xf32>
    %42 = arith.maximumf %13, %14 : vector<8x32xf32>
    %43 = arith.maximumf %18, %19 : vector<8x32xf32>
    %44 = arith.maximumf %42, %43 : vector<8x32xf32>
    %45 = arith.maximumf %14, %15 : vector<8x32xf32>
    %46 = arith.maximumf %19, %20 : vector<8x32xf32>
    %47 = arith.maximumf %45, %46 : vector<8x32xf32>
    %48 = arith.maximumf %16, %17 : vector<8x32xf32>
    %49 = arith.maximumf %21, %22 : vector<8x32xf32>
    %50 = arith.maximumf %48, %49 : vector<8x32xf32>
    %51 = arith.maximumf %17, %18 : vector<8x32xf32>
    %52 = arith.maximumf %22, %23 : vector<8x32xf32>
    %53 = arith.maximumf %51, %52 : vector<8x32xf32>
    %54 = arith.maximumf %18, %19 : vector<8x32xf32>
    %55 = arith.maximumf %23, %24 : vector<8x32xf32>
    %56 = arith.maximumf %54, %55 : vector<8x32xf32>
    %57 = arith.maximumf %19, %20 : vector<8x32xf32>
    %58 = arith.maximumf %24, %25 : vector<8x32xf32>
    %59 = arith.maximumf %57, %58 : vector<8x32xf32>
    %60 = arith.maximumf %21, %22 : vector<8x32xf32>
    %61 = arith.maximumf %26, %27 : vector<8x32xf32>
    %62 = arith.maximumf %60, %61 : vector<8x32xf32>
    %63 = arith.maximumf %22, %23 : vector<8x32xf32>
    %64 = arith.maximumf %27, %28 : vector<8x32xf32>
    %65 = arith.maximumf %63, %64 : vector<8x32xf32>
    %66 = arith.maximumf %23, %24 : vector<8x32xf32>
    %67 = arith.maximumf %28, %29 : vector<8x32xf32>
    %68 = arith.maximumf %66, %67 : vector<8x32xf32>
    %69 = arith.maximumf %24, %25 : vector<8x32xf32>
    %70 = arith.maximumf %29, %30 : vector<8x32xf32>
    %71 = arith.maximumf %69, %70 : vector<8x32xf32>
    %72 = arith.maximumf %26, %27 : vector<8x32xf32>
    %73 = arith.maximumf %31, %32 : vector<8x32xf32>
    %74 = arith.maximumf %72, %73 : vector<8x32xf32>
    %75 = arith.maximumf %27, %28 : vector<8x32xf32>
    %76 = arith.maximumf %32, %33 : vector<8x32xf32>
    %77 = arith.maximumf %75, %76 : vector<8x32xf32>
    %78 = arith.maximumf %28, %29 : vector<8x32xf32>
    %79 = arith.maximumf %33, %34 : vector<8x32xf32>
    %80 = arith.maximumf %78, %79 : vector<8x32xf32>
    %81 = arith.maximumf %29, %30 : vector<8x32xf32>
    %82 = arith.maximumf %34, %35 : vector<8x32xf32>
    %83 = arith.maximumf %81, %82 : vector<8x32xf32>
    %cst_6 = arith.constant 0.000000e+00 : f32
    %84 = vector.broadcast %cst_6 : f32 to vector<32x32xf32>
    %85 = tpu.concatenate %38, %41, %50, %53 in 0 : vector<8x32xf32>, vector<8x32xf32>, vector<8x32xf32>, vector<8x32xf32> -> vector<32x32xf32>
    %86 = tpu.concatenate %41, %44, %53, %56 in 0 : vector<8x32xf32>, vector<8x32xf32>, vector<8x32xf32>, vector<8x32xf32> -> vector<32x32xf32>
    %87 = tpu.concatenate %44, %47, %56, %59 in 0 : vector<8x32xf32>, vector<8x32xf32>, vector<8x32xf32>, vector<8x32xf32> -> vector<32x32xf32>
    %88 = tpu.concatenate %85, %86, %87 in 1 : vector<32x32xf32>, vector<32x32xf32>, vector<32x32xf32> -> vector<32x96xf32>
    %c48 = arith.constant 48 : index
    %c0_7 = arith.constant 0 : index
    %89 = vector.load %arg3[%c48, %c0_7] : memref<376x128xf32, #tpu.memory_space<vmem>>, vector<96x32xf32>
    %cst_8 = arith.constant dense<0.000000e+00> : vector<32x32xf32>
    %90 = tpu.matmul %88, %89, %cst_8 {dimension_numbers = #tpu.dot_dimension_numbers<[1], [0], [0], [1], [0, 0, 1, 1], [], []>} : vector<32x96xf32>, vector<96x32xf32>, vector<32x32xf32> -> vector<32x32xf32>
    %91 = arith.addf %84, %90 : vector<32x32xf32>
    %92 = tpu.concatenate %50, %53, %62, %65 in 0 : vector<8x32xf32>, vector<8x32xf32>, vector<8x32xf32>, vector<8x32xf32> -> vector<32x32xf32>
    %93 = tpu.concatenate %53, %56, %65, %68 in 0 : vector<8x32xf32>, vector<8x32xf32>, vector<8x32xf32>, vector<8x32xf32> -> vector<32x32xf32>
    %94 = tpu.concatenate %56, %59, %68, %71 in 0 : vector<8x32xf32>, vector<8x32xf32>, vector<8x32xf32>, vector<8x32xf32> -> vector<32x32xf32>
    %95 = tpu.concatenate %92, %93, %94 in 1 : vector<32x32xf32>, vector<32x32xf32>, vector<32x32xf32> -> vector<32x96xf32>
    %c144 = arith.constant 144 : index
    %c0_9 = arith.constant 0 : index
    %96 = vector.load %arg3[%c144, %c0_9] : memref<376x128xf32, #tpu.memory_space<vmem>>, vector<96x32xf32>
    %cst_10 = arith.constant dense<0.000000e+00> : vector<32x32xf32>
    %97 = tpu.matmul %95, %96, %cst_10 {dimension_numbers = #tpu.dot_dimension_numbers<[1], [0], [0], [1], [0, 0, 1, 1], [], []>} : vector<32x96xf32>, vector<96x32xf32>, vector<32x32xf32> -> vector<32x32xf32>
    %98 = arith.addf %91, %97 : vector<32x32xf32>
    %99 = tpu.concatenate %62, %65, %74, %77 in 0 : vector<8x32xf32>, vector<8x32xf32>, vector<8x32xf32>, vector<8x32xf32> -> vector<32x32xf32>
    %100 = tpu.concatenate %65, %68, %77, %80 in 0 : vector<8x32xf32>, vector<8x32xf32>, vector<8x32xf32>, vector<8x32xf32> -> vector<32x32xf32>
    %101 = tpu.concatenate %68, %71, %80, %83 in 0 : vector<8x32xf32>, vector<8x32xf32>, vector<8x32xf32>, vector<8x32xf32> -> vector<32x32xf32>
    %102 = tpu.concatenate %99, %100, %101 in 1 : vector<32x32xf32>, vector<32x32xf32>, vector<32x32xf32> -> vector<32x96xf32>
    %c240 = arith.constant 240 : index
    %c0_11 = arith.constant 0 : index
    %103 = vector.load %arg3[%c240, %c0_11] : memref<376x128xf32, #tpu.memory_space<vmem>>, vector<96x32xf32>
    %cst_12 = arith.constant dense<0.000000e+00> : vector<32x32xf32>
    %104 = tpu.matmul %102, %103, %cst_12 {dimension_numbers = #tpu.dot_dimension_numbers<[1], [0], [0], [1], [0, 0, 1, 1], [], []>} : vector<32x96xf32>, vector<96x32xf32>, vector<32x32xf32> -> vector<32x32xf32>
    %105 = arith.addf %98, %104 : vector<32x32xf32>
    %c369 = arith.constant 369 : index
    %c0_13 = arith.constant 0 : index
    %106 = vector.load %arg3[%c369, %c0_13] : memref<376x128xf32, #tpu.memory_space<vmem>>, vector<1x32xf32>
    %107 = vector.broadcast %106 : vector<1x32xf32> to vector<32x32xf32>
    %108 = arith.addf %105, %107 : vector<32x32xf32>
    %cst_14 = arith.constant 0.000000e+00 : f32
    %109 = vector.broadcast %cst_14 : f32 to vector<32x32xf32>
    %110 = arith.cmpf ogt, %108, %109 : vector<32x32xf32>
    %cst_15 = arith.constant 2.000000e-01 : f32
    %111 = vector.broadcast %cst_15 : f32 to vector<32x32xf32>
    %112 = arith.mulf %111, %108 : vector<32x32xf32>
    %113 = arith.select %110, %108, %112 : vector<32x32xi1>, vector<32x32xf32>
    %114 = vector.extract_strided_slice %113 {offsets = [0, 0], sizes = [8, 32], strides = [1, 1]} : vector<32x32xf32> to vector<8x32xf32>
    %115 = vector.extract_strided_slice %113 {offsets = [8, 0], sizes = [8, 32], strides = [1, 1]} : vector<32x32xf32> to vector<8x32xf32>
    %116 = arith.maximumf %114, %115 : vector<8x32xf32>
    %117 = vector.extract_strided_slice %113 {offsets = [16, 0], sizes = [8, 32], strides = [1, 1]} : vector<32x32xf32> to vector<8x32xf32>
    %118 = vector.extract_strided_slice %113 {offsets = [24, 0], sizes = [8, 32], strides = [1, 1]} : vector<32x32xf32> to vector<8x32xf32>
    %119 = arith.maximumf %117, %118 : vector<8x32xf32>
    %120 = arith.maximumf %116, %119 : vector<8x32xf32>
    %c336 = arith.constant 336 : index
    %c0_16 = arith.constant 0 : index
    %121 = vector.load %arg3[%c336, %c0_16] : memref<376x128xf32, #tpu.memory_space<vmem>>, vector<32x128xf32>
    %cst_17 = arith.constant dense<0.000000e+00> : vector<8x128xf32>
    %122 = tpu.matmul %120, %121, %cst_17 {dimension_numbers = #tpu.dot_dimension_numbers<[1], [0], [0], [1], [0, 0, 1, 1], [], []>} : vector<8x32xf32>, vector<32x128xf32>, vector<8x128xf32> -> vector<8x128xf32>
    %c370 = arith.constant 370 : index
    %c0_18 = arith.constant 0 : index
    %123 = vector.load %arg3[%c370, %c0_18] : memref<376x128xf32, #tpu.memory_space<vmem>>, vector<1x128xf32>
    %124 = vector.broadcast %123 : vector<1x128xf32> to vector<8x128xf32>
    %125 = arith.addf %122, %124 : vector<8x128xf32>
    %c0_19 = arith.constant 0 : index
    %126 = memref.load %arg1[%c0_19] : memref<1xi32, #tpu.memory_space<smem>>
    %127 = tpu.iota {dimensions = array<i32: 0>} : vector<8x128xi32>
    %128 = vector.broadcast %126 : i32 to vector<8x128xi32>
    %129 = arith.cmpi slt, %127, %128 : vector<8x128xi32>
    %130 = arith.extui %129 : vector<8x128xi1> to vector<8x128xi32>
    %131 = arith.sitofp %130 : vector<8x128xi32> to vector<8x128xf32>
    %132 = arith.sitofp %126 : i32 to f32
    %cst_20 = arith.constant 1.000000e+00 : f32
    %133 = arith.divf %cst_20, %132 : f32
    %134 = arith.mulf %125, %131 : vector<8x128xf32>
    %cst_21 = arith.constant dense<0.000000e+00> : vector<128xf32>
    %135 = vector.multi_reduction <add>, %134, %cst_21 [0] : vector<8x128xf32> to vector<128xf32>
    %136 = vector.shape_cast %135 : vector<128xf32> to vector<1x128xf32>
    %137 = vector.broadcast %133 : f32 to vector<1x128xf32>
    %138 = arith.mulf %136, %137 : vector<1x128xf32>
    %139 = vector.broadcast %138 : vector<1x128xf32> to vector<8x128xf32>
    %140 = arith.subf %125, %139 : vector<8x128xf32>
    %141 = arith.mulf %140, %140 : vector<8x128xf32>
    %142 = arith.mulf %141, %131 : vector<8x128xf32>
    %cst_22 = arith.constant dense<0.000000e+00> : vector<128xf32>
    %143 = vector.multi_reduction <add>, %142, %cst_22 [0] : vector<8x128xf32> to vector<128xf32>
    %144 = vector.shape_cast %143 : vector<128xf32> to vector<1x128xf32>
    %145 = vector.broadcast %133 : f32 to vector<1x128xf32>
    %146 = arith.mulf %144, %145 : vector<1x128xf32>
    %147 = vector.broadcast %138 : vector<1x128xf32> to vector<8x128xf32>
    %148 = arith.subf %125, %147 : vector<8x128xf32>
    %cst_23 = arith.constant 9.99999974E-6 : f32
    %149 = vector.broadcast %cst_23 : f32 to vector<1x128xf32>
    %150 = arith.addf %146, %149 : vector<1x128xf32>
    %151 = math.rsqrt %150 : vector<1x128xf32>
    %152 = vector.broadcast %151 : vector<1x128xf32> to vector<8x128xf32>
    %153 = arith.mulf %148, %152 : vector<8x128xf32>
    %c371 = arith.constant 371 : index
    %c0_24 = arith.constant 0 : index
    %154 = vector.load %arg3[%c371, %c0_24] : memref<376x128xf32, #tpu.memory_space<vmem>>, vector<1x128xf32>
    %155 = vector.broadcast %154 : vector<1x128xf32> to vector<8x128xf32>
    %156 = arith.mulf %153, %155 : vector<8x128xf32>
    %c372 = arith.constant 372 : index
    %c0_25 = arith.constant 0 : index
    %157 = vector.load %arg3[%c372, %c0_25] : memref<376x128xf32, #tpu.memory_space<vmem>>, vector<1x128xf32>
    %158 = vector.broadcast %157 : vector<1x128xf32> to vector<8x128xf32>
    %159 = arith.addf %156, %158 : vector<8x128xf32>
    %cst_26 = arith.constant 0.000000e+00 : f32
    %160 = vector.broadcast %cst_26 : f32 to vector<8x128xf32>
    %161 = arith.cmpf ogt, %159, %160 : vector<8x128xf32>
    %cst_27 = arith.constant 2.000000e-01 : f32
    %162 = vector.broadcast %cst_27 : f32 to vector<8x128xf32>
    %163 = arith.mulf %162, %159 : vector<8x128xf32>
    %164 = arith.select %161, %159, %163 : vector<8x128xi1>, vector<8x128xf32>
    %c0_28 = arith.constant 0 : index
    %c0_29 = arith.constant 0 : index
    %165 = vector.load %arg4[%c0_28, %c0_29] : memref<8x128xf32, #tpu.memory_space<vmem>>, vector<8x128xf32>
    tpu.vector_store %arg4[%c0_28, %c0_29], %164 {strides = array<i32>} : memref<8x128xf32, #tpu.memory_space<vmem>>, vector<8x128xf32>,
    return
  }
  func.func @transform_0(%arg0: i32, %arg1: memref<1xi32, #tpu.memory_space<smem>>) -> (i32, i32) {
    %c0_i32 = arith.constant 0 : i32
    %c0_i32_0 = arith.constant 0 : i32
    %c0_i32_1 = arith.constant 0 : i32
    return %c0_i32, %c0_i32_0 : i32, i32
  }
  func.func @transform_1(%arg0: i32, %arg1: memref<1xi32, #tpu.memory_space<smem>>) -> (i32, i32) {
    %c0_i32 = arith.constant 0 : i32
    %c0_i32_0 = arith.constant 0 : i32
    %c0_i32_1 = arith.constant 0 : i32
    return %c0_i32, %c0_i32_0 : i32, i32
  }
  func.func @transform_2(%arg0: i32, %arg1: memref<1xi32, #tpu.memory_space<smem>>) -> (i32, i32) {
    %c0_i32 = arith.constant 0 : i32
    %c0_i32_0 = arith.constant 0 : i32
    %c0_i32_1 = arith.constant 0 : i32
    return %c0_i32, %c0_i32_0 : i32, i32
  }
}

</mosaic_0001>

<bundles_post_ra>
// kernel: actor_encoder_forward.1
= control target key start
LH: loop header
LB: loop body
LE: loop exit
PB: predicated region body
PF: predicated region fallthrough
CT: control target
= control target key end

     0   :  { %v1405_v0 = vmov 0.0|0.0   ;;  %vm1406_vm0 = vmmov 0   ;;  %v1407_v4 = vmov 0.0   ;;  %vm49_vm1 = vcmask 392192   ;;  %s1408_s22 = smov 32   ;;  %s1409_s23 = smov 64   ;;  %s1877_s2 = inlined_call_operand.vmem [shape: f32[376,128], index: 2, kind: input, shape index: {}]   ;;  %s1878_s1 = inlined_call_operand.vmem [shape: f32[200,48], index: 1, kind: input, shape index: {}]   ;;  %s1879_s0 = inlined_call_operand.<no memory space> [shape: s32[1], index: 0, kind: input, shape index: {}]   ;;  %s1880_s3 = inlined_call_operand.vmem [shape: f32[8,128], index: 3, kind: output, shape index: {}]  }
   0x1   :  { %1299 = vmatprep.subr.bf16.mxu0 %v1405_v0  ;;  %v38_v1 = vld [vmem:[%s1877_s2] sm:$0xff]  ;;  %v39_v2 = vld [vmem:[%s1877_s2 + $0x8] sm:$0xff]  ;;  %v40_v3 = vld [vmem:[%s1877_s2 + $0x10] sm:$0xff]  ;;  %1123 = vmatprep.mubr.msk.f32.mxu0 %vm1406_vm0, %v1407_v4 }
   0x2   :  { %v1300_v5 = vpack.c.bf16 %v39_v2, %v38_v1  ;;  %v41_v6 = vld [vmem:[%s1877_s2 + $0x18] sm:$0xff]  ;;  %v42_v8 = vld [vmem:[%s1877_s2 + $0x20] sm:$0xff]  ;;  %v43_v9 = vld [vmem:[%s1877_s2 + $0x28] sm:$0xff] }
   0x3   :  { %v1303_v7 = vpack.c.bf16 %v41_v6, %v40_v3  ;;  %v1306_v10 = vpack.c.bf16 %v43_v9, %v42_v8  ;;  %v13_v11 = vld [vmem:[%s1878_s1] sm:$0xff]  ;;  %v14_v12 = vld [vmem:[%s1878_s1 + $0x8] sm:$0xff]  ;;  %v15_v13 = vld [vmem:[%s1878_s1 + $0x10] sm:$0xff] }
   0x4   :  { %1301 = vmatpush3.bf16.msra.mxu0 %v1300_v5  ;;  %v16_v14 = vld [vmem:[%s1878_s1 + $0x18] sm:$0xff]  ;;  %v17_v15 = vld [vmem:[%s1878_s1 + $0x20] sm:$0xff]  ;;  %v18_v16 = vld [vmem:[%s1878_s1 + $0x28] sm:$0xff] }
   0x5   :  { %1302 = vmatprep.subr.bf16.mxu0 %v1405_v0  ;;  %v19_v17 = vld [vmem:[%s1878_s1 + $0x30] sm:$0xff]  ;;  %v20_v18 = vld [vmem:[%s1878_s1 + $0x38] sm:$0xff]  ;;  %v21_v19 = vld [vmem:[%s1878_s1 + $0x40] sm:$0xff] }
   0x6   :  { %v22_v20 = vld [vmem:[%s1878_s1 + $0x48] sm:$0xff]  ;;  %v23_v21 = vld [vmem:[%s1878_s1 + $0x50] sm:$0xff]  ;;  %v24_v22 = vld [vmem:[%s1878_s1 + $0x58] sm:$0xff] }
   0x7   :  { %v25_v23 = vld [vmem:[%s1878_s1 + $0x60] sm:$0xff]  ;;  %v26_v24 = vld [vmem:[%s1878_s1 + $0x68] sm:$0xff]  ;;  %v27_v25 = vld [vmem:[%s1878_s1 + $0x70] sm:$0xff] }
   0x8   :  { %1304 = vmatpush3.bf16.msra.mxu0 %v1303_v7  ;;  %v28_v26 = vld [vmem:[%s1878_s1 + $0x78] sm:$0xff]  ;;  %v29_v27 = vld [vmem:[%s1878_s1 + $0x80] sm:$0xff]  ;;  %v30_v28 = vld [vmem:[%s1878_s1 + $0x88] sm:$0xff] }
   0x9   :  { %1305 = vmatprep.subr.bf16.mxu0 %v1405_v0  ;;  %v31_v29 = vld [vmem:[%s1878_s1 + $0x90] sm:$0xff]  ;;  %v32_v30 = vld [vmem:[%s1878_s1 + $0x98] sm:$0xff]  ;;  %v33_v31 = vld [vmem:[%s1878_s1 + $0xa0] sm:$0xff] }
   0xa   :  { %v34_v32 = vld [vmem:[%s1878_s1 + $0xa8] sm:$0xff]  ;;  %v35_v33 = vld [vmem:[%s1878_s1 + $0xb0] sm:$0xff]  ;;  %v36_v34 = vld [vmem:[%s1878_s1 + $0xb8] sm:$0xff] }
   0xb   :  { %v37_v35 = vld [vmem:[%s1878_s1 + $0xc0] sm:$0xff]  ;;  %v497_v36 = vld [vmem:[%s1877_s2 + $0x90] sm:$0xff]  ;;  %v498_v37 = vld [vmem:[%s1877_s2 + $0x98] sm:$0xff] }
   0xc   :  { %1307 = vmatpush3.bf16.msra.mxu0 %v1306_v10  ;;  %v499_v38 = vld [vmem:[%s1877_s2 + $0xa0] sm:$0xff]  ;;  %v1308_v39 = vpack.c.bf16 %v498_v37, %v497_v36  ;;  %v500_v40 = vld [vmem:[%s1877_s2 + $0xa8] sm:$0xff]  ;;  %v501_v42 = vld [vmem:[%s1877_s2 + $0xb0] sm:$0xff] }
   0xd   :  { %v1312_v41 = vpack.c.bf16 %v500_v40, %v499_v38  ;;  %v502_v43 = vld [vmem:[%s1877_s2 + $0xb8] sm:$0xff]  ;;  %v503_v45 = vld [vmem:[%s1877_s2 + $0xc0] sm:$0xff]  ;;  %v504_v46 = vld [vmem:[%s1877_s2 + $0xc8] sm:$0xff] }
   0xe   :  { %1309 = vmatprep.subr.bf16.mxu1 %v1308_v39  ;;  %v1316_v44 = vpack.c.bf16 %v502_v43, %v501_v42  ;;  %v1320_v47 = vpack.c.bf16 %v504_v46, %v503_v45  ;;  %v1628_v48 = vld [vmem:[%s1877_s2 + $0x170] ss:$0 sm:$0xff] }
   0xf   :  { %1124 = vmatmul.mubr.msk.f32.vlgmr.msra.gmra.mrb[0].mxu0 %vm49_vm1, %v13_v11  ;;  %1311 = vmatpush3.bf16.msra.mxu1 %v1308_v39 }
  0x10   :  { %1126 = vmatprep.mubr.msk.f32.mxu0 %vm1406_vm0, %v1407_v4  ;;  %1313 = vmatprep.subr.bf16.mxu1 %v1312_v41 }
  0x13   :  { %1127 = vmatmul.mubr.msk.f32.gmra.mrb[2].mxu0 %vm49_vm1, %v14_v12  ;;  %1315 = vmatpush3.bf16.msra.mxu1 %v1312_v41 }
  0x14   :  { %1129 = vmatprep.mubr.msk.f32.mxu0 %vm1406_vm0, %v1407_v4  ;;  %1317 = vmatprep.subr.bf16.mxu1 %v1316_v44 }
  0x17   :  { %1130 = vmatmul.mubr.msk.f32.gmra.mrb[4].mxu0 %vm49_vm1, %v15_v13  ;;  %1319 = vmatpush3.bf16.msra.mxu1 %v1316_v44 }
  0x18   :  { %1132 = vmatprep.mubr.msk.f32.mxu0 %vm1406_vm0, %v1407_v4  ;;  %1321 = vmatprep.subr.bf16.mxu1 %v1320_v47 }
  0x1b   :  { %1133 = vmatmul.mubr.msk.f32.gmra.mrb[6].mxu0 %vm49_vm1, %v16_v14  ;;  %1323 = vmatpush3.bf16.msra.mxu1 %v1320_v47 }
  0x1c   :  { %1135 = vmatprep.mubr.msk.f32.mxu0 %vm1406_vm0, %v1407_v4 }
  0x1f   :  { %1136 = vmatmul.mubr.msk.f32.gmra.mrb[8].mxu0 %vm49_vm1, %v17_v15 }
  0x20   :  { %1138 = vmatprep.mubr.msk.f32.mxu0 %vm1406_vm0, %v1407_v4 }
  0x23   :  { %1139 = vmatmul.mubr.msk.f32.gmra.mrb[10].mxu0 %vm49_vm1, %v18_v16 }
  0x24   :  { %1141 = vmatprep.mubr.msk.f32.mxu0 %vm1406_vm0, %v1407_v4 }
  0x27   :  { %1142 = vmatmul.mubr.msk.f32.gmra.mrb[12].mxu0 %vm49_vm1, %v19_v17 }
  0x28   :  { %1144 = vmatprep.mubr.msk.f32.mxu0 %vm1406_vm0, %v1407_v4 }
  0x2b   :  { %1145 = vmatmul.mubr.msk.f32.gmra.mrb[14].mxu0 %vm49_vm1, %v20_v18 }
  0x2c   :  { %1147 = vmatprep.mubr.msk.f32.mxu0 %vm1406_vm0, %v1407_v4 }
  0x2f   :  { %1148 = vmatmul.mubr.msk.f32.gmra.mrb[16].mxu0 %vm49_vm1, %v21_v19 }
  0x30   :  { %1150 = vmatprep.mubr.msk.f32.mxu0 %vm1406_vm0, %v1407_v4 }
  0x33   :  { %1151 = vmatmul.mubr.msk.f32.gmra.mrb[18].mxu0 %vm49_vm1, %v22_v20 }
  0x34   :  { %1153 = vmatprep.mubr.msk.f32.mxu0 %vm1406_vm0, %v1407_v4 }
  0x37   :  { %1154 = vmatmul.mubr.msk.f32.gmra.mrb[20].mxu0 %vm49_vm1, %v23_v21 }
  0x38   :  { %1156 = vmatprep.mubr.msk.f32.mxu0 %vm1406_vm0, %v1407_v4 }
  0x3b   :  { %1157 = vmatmul.mubr.msk.f32.gmra.mrb[22].mxu0 %vm49_vm1, %v24_v22 }
  0x3c   :  { %1159 = vmatprep.mubr.msk.f32.mxu0 %vm1406_vm0, %v1407_v4 }
  0x3f   :  { %1160 = vmatmul.mubr.msk.f32.gmra.mrb[24].mxu0 %vm49_vm1, %v25_v23 }
  0x40   :  { %1162 = vmatprep.mubr.msk.f32.mxu0 %vm1406_vm0, %v1407_v4 }
  0x43   :  { %1163 = vmatmul.mubr.msk.f32.gmra.mrb[26].mxu0 %vm49_vm1, %v26_v24 }
  0x44   :  { %1165 = vmatprep.mubr.msk.f32.mxu0 %vm1406_vm0, %v1407_v4 }
  0x47   :  { %1166 = vmatmul.mubr.msk.f32.gmra.mrb[28].mxu0 %vm49_vm1, %v27_v25 }
  0x48   :  { %1168 = vmatprep.mubr.msk.f32.mxu0 %vm1406_vm0, %v1407_v4 }
  0x4b   :  { %1169 = vmatmul.mubr.msk.f32.gmra.mrb[30].mxu0 %vm49_vm1, %v28_v26 }
  0x4c   :  { %1171 = vmatprep.mubr.msk.f32.mxu0 %vm1406_vm0, %v1407_v4 }
  0x4f   :  { %1172 = vmatmul.mubr.msk.f32.gmra.mrb[32].mxu0 %vm49_vm1, %v29_v27 }
  0x50   :  { %1174 = vmatprep.mubr.msk.f32.mxu0 %vm1406_vm0, %v1407_v4 }
  0x53   :  { %1175 = vmatmul.mubr.msk.f32.gmra.mrb[34].mxu0 %vm49_vm1, %v30_v28 }
  0x54   :  { %1177 = vmatprep.mubr.msk.f32.mxu0 %vm1406_vm0, %v1407_v4 }
  0x57   :  { %1178 = vmatmul.mubr.msk.f32.gmra.mrb[36].mxu0 %vm49_vm1, %v31_v29 }
  0x58   :  { %1180 = vmatprep.mubr.msk.f32.mxu0 %vm1406_vm0, %v1407_v4 }
  0x5b   :  { %1181 = vmatmul.mubr.msk.f32.gmra.mrb[38].mxu0 %vm49_vm1, %v32_v30 }
  0x5c   :  { %1183 = vmatprep.mubr.msk.f32.mxu0 %vm1406_vm0, %v1407_v4 }
  0x5f   :  { %1184 = vmatmul.mubr.msk.f32.gmra.mrb[40].mxu0 %vm49_vm1, %v33_v31 }
  0x60   :  { %1186 = vmatprep.mubr.msk.f32.mxu0 %vm1406_vm0, %v1407_v4 }
  0x63   :  { %1187 = vmatmul.mubr.msk.f32.gmra.mrb[42].mxu0 %vm49_vm1, %v34_v32 }
  0x64   :  { %1189 = vmatprep.mubr.msk.f32.mxu0 %vm1406_vm0, %v1407_v4 }
  0x67   :  { %1190 = vmatmul.mubr.msk.f32.gmra.mrb[44].mxu0 %vm49_vm1, %v35_v33 }
  0x68   :  { %1192 = vmatprep.mubr.msk.f32.mxu0 %vm1406_vm0, %v1407_v4 }
  0x6b   :  { %1193 = vmatmul.mubr.msk.f32.gmra.mrb[46].mxu0 %vm49_vm1, %v36_v34 }
  0x6c   :  { %1195 = vmatprep.mubr.msk.f32.mxu0 %vm1406_vm0, %v1407_v4 }
  0x6f   :  { %1196 = vmatmul.mubr.msk.f32.gmra.mrb[48].mxu0 %vm49_vm1, %v37_v35 }
  0xe2   :  { %v191_v49 = vpop.f32.mrb[0].mxu0 }
  0xe3   :  { %v192_v50 = vadd.f32 %v1628_v48, %v191_v49  ;;  %v1125_v51 = vpop.f32.mrb[1].mxu0 }
  0xe5   :  { %v340_v53 = vmul.f32 0.2, %v192_v50  ;;  %vm315_vm2 = vcmp.gt.f32.partialorder %v192_v50, 0.0 }
  0xe6   :  { %v196_v52 = vpop.f32.mrb[2].mxu0 }
  0xe7   :  { %v197_v54 = vadd.f32 %v1628_v48, %v196_v52  ;;  %v1128_v55 = vpop.f32.mrb[3].mxu0  ;;  %v365_v58 = vsel %vm315_vm2, %v192_v50, %v340_v53  ;;  %v505_v52 = vld [vmem:[%s1877_s2 + $0xd0] sm:$0xff]  ;;  %v506_v53 = vld [vmem:[%s1877_s2 + $0xd8] sm:$0xff] }
  0xe9   :  { %vm316_vm3 = vcmp.gt.f32.partialorder %v197_v54, 0.0  ;;  %v341_v56 = vmul.f32 0.2, %v197_v54 }
  0xea   :  { %v201_v57 = vpop.f32.mrb[4].mxu0 }
  0xeb   :  { %v366_v59 = vsel %vm316_vm3, %v197_v54, %v341_v56  ;;  %v202_v60 = vadd.f32 %v1628_v48, %v201_v57  ;;  %v1131_v61 = vpop.f32.mrb[5].mxu0  ;;  %v1324_v54 = vpack.c.bf16 %v506_v53, %v505_v52 }
  0xec   :  { %v390_v62 = vmax.f32 %v365_v58, %v366_v59  ;;  %v508_v61 = vld [vmem:[%s1877_s2 + $0xe8] sm:$0xff] }
  0xed   :  { %vm317_vm4 = vcmp.gt.f32.partialorder %v202_v60, 0.0  ;;  %v342_v63 = vmul.f32 0.2, %v202_v60  ;;  %1325 = vmatprep.subr.bf16.mxu1 %v1324_v54 }
  0xee   :  { %v206_v1 = vpop.f32.mrb[6].mxu0  ;;  %1327 = vmatpush3.bf16.msra.mxu1 %v1324_v54 }
  0xef   :  { %v367_v2 = vsel %vm317_vm4, %v202_v60, %v342_v63  ;;  %v207_v3 = vadd.f32 %v1628_v48, %v206_v1  ;;  %v1134_v5 = vpop.f32.mrb[7].mxu0  ;;  %v507_v60 = vld [vmem:[%s1877_s2 + $0xe0] sm:$0xff] }
  0xf0   :  { %v393_v6 = vmax.f32 %v366_v59, %v367_v2  ;;  %v1328_v63 = vpack.c.bf16 %v508_v61, %v507_v60 }
  0xf1   :  { %vm318_vm5 = vcmp.gt.f32.partialorder %v207_v3, 0.0  ;;  %v343_v7 = vmul.f32 0.2, %v207_v3 }
  0xf2   :  { %v211_v8 = vpop.f32.mrb[8].mxu0  ;;  %1329 = vmatprep.subr.bf16.mxu1 %v1328_v63 }
  0xf3   :  { %v368_v9 = vsel %vm318_vm5, %v207_v3, %v343_v7  ;;  %v212_v10 = vadd.f32 %v1628_v48, %v211_v8  ;;  %v1137_v11 = vpop.f32.mrb[9].mxu0  ;;  %1331 = vmatpush3.bf16.msra.mxu1 %v1328_v63  ;;  %v466_v8 = vld [vmem:[%s1877_s2 + $0x30] sm:$0xff] }
  0xf4   :  { %v396_v12 = vmax.f32 %v367_v2, %v368_v9 }
  0xf5   :  { %vm319_vm6 = vcmp.gt.f32.partialorder %v212_v10, 0.0  ;;  %v344_v13 = vmul.f32 0.2, %v212_v10 }
  0xf6   :  { %v216_v14 = vpop.f32.mrb[10].mxu0 }
  0xf7   :  { %v369_v15 = vsel %vm319_vm6, %v212_v10, %v344_v13  ;;  %v217_v16 = vadd.f32 %v1628_v48, %v216_v14  ;;  %v1140_v17 = vpop.f32.mrb[11].mxu0 }
  0xf8   :  { %v399_v18 = vmax.f32 %v368_v9, %v369_v15  ;;  %v467_v9 = vld [vmem:[%s1877_s2 + $0x38] sm:$0xff] }
  0xf9   :  { %v345_v20 = vmul.f32 0.2, %v217_v16  ;;  %vm320_vm7 = vcmp.gt.f32.partialorder %v217_v16, 0.0  ;;  %v1677_v11 = vpack.c.bf16 %v467_v9, %v466_v8 }
  0xfa   :  { %v221_v19 = vpop.f32.mrb[12].mxu0 }
  0xfb   :  { %v222_v21 = vadd.f32 %v1628_v48, %v221_v19  ;;  %v1143_v22 = vpop.f32.mrb[13].mxu0  ;;  %v370_v25 = vsel %vm320_vm7, %v217_v16, %v345_v20  ;;  %1333 = vmatprep.subr.bf16.mxu1 %v1677_v11 }
  0xfd   :  { %vm321_vm8 = vcmp.gt.f32.partialorder %v222_v21, 0.0  ;;  %v346_v23 = vmul.f32 0.2, %v222_v21 }
  0xfe   :  { %v226_v24 = vpop.f32.mrb[14].mxu0 }
  0xff   :  { %v227_v26 = vadd.f32 %v1628_v48, %v226_v24  ;;  %v1146_v27 = vpop.f32.mrb[15].mxu0  ;;  %v371_v28 = vsel %vm321_vm8, %v222_v21, %v346_v23 }
 0x100   :  { %v1638_v29 = vmax.f32 %v370_v25, %v371_v28 }
 0x101   :  { %vm322_vm9 = vcmp.gt.f32.partialorder %v227_v26, 0.0  ;;  %v347_v30 = vmul.f32 0.2, %v227_v26 }
 0x102   :  { %v231_v31 = vpop.f32.mrb[16].mxu0  ;;  %v1641_v32 = vmax.f32 %v390_v62, %v1638_v29 }
 0x103   :  { %v232_v33 = vadd.f32 %v1628_v48, %v231_v31  ;;  %v1149_v34 = vpop.f32.mrb[17].mxu0  ;;  %v372_v35 = vsel %vm322_vm9, %v227_v26, %v347_v30 }
 0x104   :  { %v394_v36 = vmax.f32 %v371_v28, %v372_v35 }
 0x105   :  { %vm323_vm10 = vcmp.gt.f32.partialorder %v232_v33, 0.0  ;;  %v348_v37 = vmul.f32 0.2, %v232_v33 }
 0x106   :  { %v236_v38 = vpop.f32.mrb[18].mxu0  ;;  %v1644_v39 = vmax.f32 %v393_v6, %v394_v36 }
 0x107   :  { %v237_v40 = vadd.f32 %v1628_v48, %v236_v38  ;;  %v1152_v41 = vpop.f32.mrb[19].mxu0  ;;  %v373_v42 = vsel %vm323_vm10, %v232_v33, %v348_v37 }
 0x108   :  { %v397_v43 = vmax.f32 %v372_v35, %v373_v42 }
 0x109   :  { %vm324_vm11 = vcmp.gt.f32.partialorder %v237_v40, 0.0  ;;  %v349_v44 = vmul.f32 0.2, %v237_v40 }
 0x10a   :  { %v241_v45 = vpop.f32.mrb[20].mxu0  ;;  %v1647_v46 = vmax.f32 %v396_v12, %v397_v43 }
 0x10b   :  { %v374_v47 = vsel %vm324_vm11, %v237_v40, %v349_v44  ;;  %v242_v49 = vadd.f32 %v1628_v48, %v241_v45  ;;  %v1155_v50 = vpop.f32.mrb[21].mxu0 }
 0x10c   :  { %v1650_v51 = vmax.f32 %v373_v42, %v374_v47 }
 0x10d   :  { %v350_v57 = vmul.f32 0.2, %v242_v49  ;;  %vm325_vm12 = vcmp.gt.f32.partialorder %v242_v49, 0.0 }
 0x10e   :  { %v246_v55 = vpop.f32.mrb[22].mxu0  ;;  %v1659_v56 = vmax.f32 %v399_v18, %v1650_v51 }
 0x10f   :  { %v247_v58 = vadd.f32 %v1628_v48, %v246_v55  ;;  %v1158_v59 = vpop.f32.mrb[23].mxu0  ;;  %v375_v2 = vsel %vm325_vm12, %v242_v49, %v350_v57  ;;  %vm456_vm12 = vcmask 261120  }
 0x111   :  { %vm326_vm13 = vcmp.gt.f32.partialorder %v247_v58, 0.0  ;;  %v351_v62 = vmul.f32 0.2, %v247_v58 }
 0x112   :  { %v251_v1 = vpop.f32.mrb[24].mxu0 }
 0x113   :  { %v252_v3 = vadd.f32 %v1628_v48, %v251_v1  ;;  %v1161_v5 = vpop.f32.mrb[25].mxu0  ;;  %v376_v6 = vsel %vm326_vm13, %v247_v58, %v351_v62  ;;  %vm461_vm13 = vcmask 523264  }
 0x114   :  { %v1669_v7 = vmax.f32 %v375_v2, %v376_v6 }
 0x115   :  { %vm327_vm14 = vcmp.gt.f32.partialorder %v252_v3, 0.0  ;;  %v352_v10 = vmul.f32 0.2, %v252_v3 }
 0x116   :  { %v256_v12 = vpop.f32.mrb[26].mxu0  ;;  %v403_v13 = vmax.f32 %v1638_v29, %v1669_v7 }
 0x117   :  { %v257_v14 = vadd.f32 %v1628_v48, %v256_v12  ;;  %v1164_v15 = vpop.f32.mrb[27].mxu0  ;;  %v377_v16 = vsel %vm327_vm14, %v252_v3, %v352_v10  ;;  %vm509_vm14 = vcmask 785408  }
 0x118   :  { %v404_v17 = vmax.f32 %v376_v6, %v377_v16 }
 0x119   :  { %vm328_vm15 = vcmp.gt.f32.partialorder %v257_v14, 0.0  ;;  %v353_v18 = vmul.f32 0.2, %v257_v14 }
 0x11a   :  { %v261_v19 = vpop.f32.mrb[28].mxu0  ;;  %v1683_v20 = vmax.f32 %v394_v36, %v404_v17 }
 0x11b   :  { %v262_v21 = vadd.f32 %v1628_v48, %v261_v19  ;;  %v1167_v22 = vpop.f32.mrb[29].mxu0  ;;  %v378_v23 = vsel %vm328_vm15, %v257_v14, %v353_v18 }
 0x11c   :  { %434 = vrot.lane.b32.xlu0 %v1683_v20, %s1408_s22  ;;  %v406_v24 = vmax.f32 %v377_v16, %v378_v23 }
 0x11d   :  { %vm329_vm1 = vcmp.gt.f32.partialorder %v262_v21, 0.0  ;;  %v354_v25 = vmul.f32 0.2, %v262_v21 }
 0x11e   :  { %v266_v26 = vpop.f32.mrb[30].mxu0  ;;  %v407_v27 = vmax.f32 %v397_v43, %v406_v24 }
 0x11f   :  { %v379_v28 = vsel %vm329_vm1, %v262_v21, %v354_v25  ;;  %v267_v30 = vadd.f32 %v1628_v48, %v266_v26  ;;  %v1170_v31 = vpop.f32.mrb[31].mxu0 }
 0x120   :  { %448 = vrot.lane.b32.xlu1 %v407_v27, %s1409_s23  ;;  %v408_v33 = vmax.f32 %v378_v23, %v379_v28  ;;  %436 = vrot.lane.b32.xlu0 %v407_v27, %s1408_s22 }
 0x121   :  { %v355_v36 = vmul.f32 0.2, %v267_v30  ;;  %vm330_vm2 = vcmp.gt.f32.partialorder %v267_v30, 0.0 }
 0x122   :  { %v271_v34 = vpop.f32.mrb[32].mxu0  ;;  %v409_v35 = vmax.f32 %v1650_v51, %v408_v33 }
 0x123   :  { %v272_v37 = vadd.f32 %v1628_v48, %v271_v34  ;;  %v1173_v38 = vpop.f32.mrb[33].mxu0  ;;  %v380_v42 = vsel %vm330_vm2, %v267_v30, %v355_v36 }
 0x124   :  { %430 = vrot.lane.b32.xlu0 %v1644_v39, %s1408_s22  ;;  %450 = vrot.lane.b32.xlu1 %v409_v35, %s1409_s23 }
 0x125   :  { %vm331_vm3 = vcmp.gt.f32.partialorder %v272_v37, 0.0  ;;  %v356_v40 = vmul.f32 0.2, %v272_v37 }
 0x126   :  { %v276_v41 = vpop.f32.mrb[34].mxu0 }
 0x127   :  { %v381_v43 = vsel %vm331_vm3, %v272_v37, %v356_v40  ;;  %v277_v44 = vadd.f32 %v1628_v48, %v276_v41  ;;  %v1176_v45 = vpop.f32.mrb[35].mxu0 }
 0x128   :  { %v1697_v47 = vmax.f32 %v380_v42, %v381_v43  ;;  %432 = vrot.lane.b32.xlu1 %v1647_v46, %s1408_s22 }
 0x129   :  { %vm332_vm4 = vcmp.gt.f32.partialorder %v277_v44, 0.0  ;;  %v357_v49 = vmul.f32 0.2, %v277_v44 }
 0x12a   :  { %v281_v50 = vpop.f32.mrb[36].mxu0  ;;  %v411_v51 = vmax.f32 %v1669_v7, %v1697_v47 }
 0x12b   :  { %v382_v52 = vsel %vm332_vm4, %v277_v44, %v357_v49  ;;  %v282_v53 = vadd.f32 %v1628_v48, %v281_v50  ;;  %v1179_v54 = vpop.f32.mrb[37].mxu0 }
 0x12c   :  { %v412_v55 = vmax.f32 %v381_v43, %v382_v52  ;;  %v469_v54 = vld [vmem:[%s1877_s2 + $0x48] sm:$0xff] }
 0x12d   :  { %vm333_vm5 = vcmp.gt.f32.partialorder %v282_v53, 0.0  ;;  %v358_v57 = vmul.f32 0.2, %v282_v53 }
 0x12e   :  { %v286_v58 = vpop.f32.mrb[38].mxu0  ;;  %v1704_v59 = vmax.f32 %v404_v17, %v412_v55 }
 0x12f   :  { %v383_v60 = vsel %vm333_vm5, %v282_v53, %v358_v57  ;;  %v287_v61 = vadd.f32 %v1628_v48, %v286_v58  ;;  %v1182_v62 = vpop.f32.mrb[39].mxu0  ;;  %v468_v53 = vld [vmem:[%s1877_s2 + $0x40] sm:$0xff]  ;;  %v470_v58 = vld [vmem:[%s1877_s2 + $0x50] sm:$0xff] }
 0x130   :  { %480 = vrot.lane.b32.xlu0 %v1704_v59, %s1408_s22  ;;  %v414_v63 = vmax.f32 %v382_v52, %v383_v60  ;;  %v1336_v57 = vpack.c.bf16 %v469_v54, %v468_v53  ;;  %v473_v62 = vld [vmem:[%s1877_s2 + $0x68] sm:$0xff]  ;;  %v849_v53 = vld [vmem:[%s1877_s2 + $0x158] sm:$0xff] }
 0x131   :  { %vm334_vm6 = vcmp.gt.f32.partialorder %v287_v61, 0.0  ;;  %v359_v1 = vmul.f32 0.2, %v287_v61 }
 0x132   :  { %v415_v2 = vmax.f32 %v406_v24, %v414_v63  ;;  %v291_v3 = vpop.f32.mrb[40].mxu0 }
 0x133   :  { %v384_v5 = vsel %vm334_vm6, %v287_v61, %v359_v1  ;;  %v292_v6 = vadd.f32 %v1628_v48, %v291_v3  ;;  %v1185_v8 = vpop.f32.mrb[41].mxu0 }
 0x134   :  { %487 = vrot.lane.b32.xlu0 %v415_v2, %s1409_s23  ;;  %482 = vrot.lane.b32.xlu1 %v415_v2, %s1408_s22  ;;  %v416_v9 = vmax.f32 %v383_v60, %v384_v5  ;;  %v471_v60 = vld [vmem:[%s1877_s2 + $0x58] sm:$0xff]  ;;  %v474_v2 = vld [vmem:[%s1877_s2 + $0x70] sm:$0xff] }
 0x135   :  { %v360_v10 = vmul.f32 0.2, %v292_v6  ;;  %vm335_vm7 = vcmp.gt.f32.partialorder %v292_v6, 0.0  ;;  %v1340_v61 = vpack.c.bf16 %v471_v60, %v470_v58  ;;  %v476_v8 = vld [vmem:[%s1877_s2 + $0x80] sm:$0xff] }
 0x136   :  { %v296_v12 = vpop.f32.mrb[42].mxu0  ;;  %v417_v14 = vmax.f32 %v408_v33, %v416_v9 }
 0x137   :  { %v297_v15 = vadd.f32 %v1628_v48, %v296_v12  ;;  %v1188_v16 = vpop.f32.mrb[43].mxu0  ;;  %v385_v17 = vsel %vm335_vm7, %v292_v6, %v360_v10 }
 0x138   :  { %444 = vrot.lane.b32.xlu0 %v1647_v46, %s1409_s23  ;;  %489 = vrot.lane.b32.xlu1 %v417_v14, %s1409_s23 }
 0x139   :  { %vm336_vm8 = vcmp.gt.f32.partialorder %v297_v15, 0.0  ;;  %v361_v18 = vmul.f32 0.2, %v297_v15 }
 0x13a   :  { %v301_v19 = vpop.f32.mrb[44].mxu0 }
 0x13b   :  { %v386_v21 = vsel %vm336_vm8, %v297_v15, %v361_v18  ;;  %v302_v22 = vadd.f32 %v1628_v48, %v301_v19  ;;  %v1191_v23 = vpop.f32.mrb[45].mxu0  ;;  %v718_v18 = vld [vmem:[%s1877_s2 + $0xf8] sm:$0xff] }
 0x13c   :  { %v418_v24 = vmax.f32 %v385_v17, %v386_v21  ;;  %446 = vrot.lane.b32.xlu1 %v1659_v56, %s1409_s23  ;;  %v717_v17 = vld [vmem:[%s1877_s2 + $0xf0] sm:$0xff] }
 0x13d   :  { %vm337_vm9 = vcmp.gt.f32.partialorder %v302_v22, 0.0  ;;  %v362_v25 = vmul.f32 0.2, %v302_v22 }
 0x13e   :  { %v306_v26 = vpop.f32.mrb[46].mxu0  ;;  %v1720_v27 = vmax.f32 %v1697_v47, %v418_v24  ;;  %v719_v24 = vld [vmem:[%s1877_s2 + $0x100] sm:$0xff] }
 0x13f   :  { %v387_v46 = vsel %vm337_vm9, %v302_v22, %v362_v25  ;;  %v307_v28 = vadd.f32 %v1628_v48, %v306_v26  ;;  %v1194_v30 = vpop.f32.mrb[47].mxu0  ;;  %v720_v25 = vld [vmem:[%s1877_s2 + $0x108] sm:$0xff] }
 0x140   :  { %v420_v31 = vmax.f32 %v386_v21, %v387_v46  ;;  %v1356_v21 = vpack.c.bf16 %v718_v18, %v717_v17  ;;  %v1360_v26 = vpack.c.bf16 %v720_v25, %v719_v24  ;;  %v722_v30 = vld [vmem:[%s1877_s2 + $0x118] sm:$0xff]  ;;  %v931_v17 = vlaneseq }
 0x141   :  { %vm338_vm10 = vcmp.gt.f32.partialorder %v307_v28, 0.0  ;;  %v363_v33 = vmul.f32 0.2, %v307_v28 }
 0x142   :  { %v311_v34 = vpop.f32.mrb[48].mxu0  ;;  %v1723_v35 = vmax.f32 %v412_v55, %v420_v31  ;;  %v723_v31 = vld [vmem:[%s1877_s2 + $0x120] sm:$0xff]  ;;  %v932_v18 = vshrl.u32 %v931_v17, 7 }
 0x143   :  { %v388_v36 = vsel %vm338_vm10, %v307_v28, %v363_v33  ;;  %v312_v37 = vadd.f32 %v1628_v48, %v311_v34  ;;  %v1197_v56 = vpop.f32.mrb[49].mxu0  ;;  %v721_v28 = vld [vmem:[%s1877_s2 + $0x110] sm:$0xff]  ;;  %v724_v33 = vld [vmem:[%s1877_s2 + $0x128] sm:$0xff] }
 0x144   :  { %700 = vrot.lane.b32.xlu0 %v1723_v35, %s1408_s22  ;;  %v422_v38 = vmax.f32 %v387_v46, %v388_v36  ;;  %v1368_v34 = vpack.c.bf16 %v724_v33, %v723_v31 }
 0x145   :  { %vm339_vm11 = vcmp.gt.f32.partialorder %v312_v37, 0.0  ;;  %v364_v40 = vmul.f32 0.2, %v312_v37 }
 0x146   :  { %v423_v41 = vmax.f32 %v414_v63, %v422_v38  ;;  %v727_v38 = vld [vmem:[%s1877_s2 + $0x140] sm:$0xff] }
 0x147   :  { %v389_v42 = vsel %vm339_vm11, %v312_v37, %v364_v40  ;;  %v726_v37 = vld [vmem:[%s1877_s2 + $0x138] sm:$0xff]  ;;  %v728_v40 = vld [vmem:[%s1877_s2 + $0x148] sm:$0xff] }
 0x148   :  { %707 = vrot.lane.b32.xlu0 %v423_v41, %s1409_s23  ;;  %702 = vrot.lane.b32.xlu1 %v423_v41, %s1408_s22  ;;  %v424_v43 = vmax.f32 %v388_v36, %v389_v42  ;;  %v725_v36 = vld [vmem:[%s1877_s2 + $0x130] sm:$0xff]  ;;  %v1376_v41 = vpack.c.bf16 %v728_v40, %v727_v38  ;;  %s937_s22 = scvt.s32.f32 %s1879_s0 }
 0x149   :  { %v1372_v56 = vpack.c.bf16 %v726_v37, %v725_v36 }
 0x14a   :  { %v425_v44 = vmax.f32 %v416_v9, %v424_v43  ;;  %v477_v9 = vld [vmem:[%s1877_s2 + $0x88] sm:$0xff] }
 0x14b   :  { %v1352_v15 = vpack.c.bf16 %v477_v9, %v476_v8 }
 0x14c   :  { %709 = vrot.lane.b32.xlu1 %v425_v44, %s1409_s23 }
 0x18e   :  { %v435_v45 = vpop.permute.xlu0 %434 }
 0x18f   :  { %v459_v48 = vsel %vm456_vm12, %v403_v13, %v435_v45 }
 0x192   :  { %v449_v49 = vpop.permute.xlu1 %448  ;;  %v437_v50 = vpop.permute.xlu0 %436 }
 0x193   :  { %v464_v52 = vsel %vm461_vm13, %v459_v48, %v449_v49  ;;  %v460_v55 = vsel %vm456_vm12, %v1683_v20, %v437_v50  ;;  %v472_v20 = vld [vmem:[%s1877_s2 + $0x60] sm:$0xff] }
 0x194   :  { %1222 = vmatprep.mubr.msk.f32.mxu1 %vm509_vm14, %v464_v52  ;;  %v1344_v1 = vpack.c.bf16 %v473_v62, %v472_v20 }
 0x196   :  { %v451_v29 = vpop.permute.xlu1 %450  ;;  %v431_v63 = vpop.permute.xlu0 %430 }
 0x197   :  { %v465_v13 = vsel %vm461_vm13, %v460_v55, %v451_v29  ;;  %v457_v7 = vsel %vm456_vm12, %v1641_v32, %v431_v63  ;;  %v851_v55 = vld [vmem:[%s1877_s2 + $0x168] sm:$0xff] }
 0x198   :  { %1223 = vmatmul.mubr.msk.f32.vlgmr.msra.gmra.mrb[0].mxu1 %vm509_vm14, %v465_v13 }
 0x199   :  { %1335 = vmatpush3.bf16.msra.mxu1 %v1677_v11  ;;  %v475_v11 = vld [vmem:[%s1877_s2 + $0x78] sm:$0xff] }
 0x19a   :  { %1337 = vmatprep.subr.bf16.mxu1 %v1336_v57  ;;  %v433_v3 = vpop.permute.xlu1 %432  ;;  %v1348_v6 = vpack.c.bf16 %v475_v11, %v474_v2 }
 0x19b   :  { %v458_v32 = vsel %vm456_vm12, %v1644_v39, %v433_v3  ;;  %v1364_v39 = vpack.c.bf16 %v722_v30, %v721_v28 }
 0x19d   :  { %1339 = vmatpush3.bf16.msra.mxu1 %v1336_v57  ;;  %v938_v57 = vstv %s937_s22 }
 0x19e   :  { %1341 = vmatprep.subr.bf16.mxu1 %v1340_v61  ;;  %1401 = vrcp.f32 %v938_v57 }
 0x1a1   :  { %1343 = vmatpush3.bf16.msra.mxu1 %v1340_v61 }
 0x1a2   :  { %v481_v5 = vpop.permute.xlu0 %480  ;;  %1345 = vmatprep.subr.bf16.mxu1 %v1344_v1 }
 0x1a3   :  { %v493_v10 = vsel %vm456_vm12, %v411_v51, %v481_v5 }
 0x1a5   :  { %1347 = vmatpush3.bf16.msra.mxu1 %v1344_v1 }
 0x1a6   :  { %v488_v12 = vpop.permute.xlu0 %487  ;;  %v483_v14 = vpop.permute.xlu1 %482  ;;  %1349 = vmatprep.subr.bf16.mxu1 %v1348_v6 }
 0x1a7   :  { %v495_v16 = vsel %vm461_vm13, %v493_v10, %v488_v12  ;;  %v494_v47 = vsel %vm456_vm12, %v1704_v59, %v483_v14 }
 0x1a8   :  { %1225 = vmatprep.mubr.msk.f32.mxu1 %vm509_vm14, %v495_v16 }
 0x1a9   :  { %1351 = vmatpush3.bf16.msra.mxu1 %v1348_v6 }
 0x1aa   :  { %v445_v51 = vpop.permute.xlu0 %444  ;;  %v490_v19 = vpop.permute.xlu1 %489  ;;  %1353 = vmatprep.subr.bf16.mxu1 %v1352_v15 }
 0x1ab   :  { %v462_v22 = vsel %vm461_vm13, %v457_v7, %v445_v51  ;;  %v496_v23 = vsel %vm461_vm13, %v494_v47, %v490_v19  ;;  %v933_v7 = vstv %s1879_s0  ;;  %v1022_v47 = vld [vmem:[%s1877_s2 + $0x172] ss:$0 sm:$0xff] }
 0x1ac   :  { %1226 = vmatmul.mubr.msk.f32.gmra.mrb[2].mxu1 %vm509_vm14, %v496_v23  ;;  %vm934_vm3 = vcmp.lt.s32.totalorder %v932_v18, %v933_v7 }
 0x1ad   :  { %1355 = vmatpush3.bf16.msra.mxu1 %v1352_v15  ;;  %1252 = vmatprep.mubr.msk.f32.mxu1 %vm509_vm14, %v462_v22  ;;  %v1024_v19 = vsel %vm934_vm3, 1.0, %v1407_v4 }
 0x1ae   :  { %v447_v59 = vpop.permute.xlu1 %446  ;;  %1357 = vmatprep.subr.bf16.mxu1 %v1356_v21 }
 0x1af   :  { %v463_v46 = vsel %vm461_vm13, %v458_v32, %v447_v59 }
 0x1b0   :  { %1253 = vmatmul.mubr.msk.f32.vlgmr.msra.gmra.mrb[0].mxu1 %vm509_vm14, %v463_v46 }
 0x1b1   :  { %1359 = vmatpush3.bf16.msra.mxu1 %v1356_v21  ;;  %1255 = vmatprep.mubr.msk.f32.mxu1 %vm509_vm14, %v464_v52 }
 0x1b2   :  { %1361 = vmatprep.subr.bf16.mxu1 %v1360_v26 }
 0x1b4   :  { %1256 = vmatmul.mubr.msk.f32.gmra.mrb[2].mxu1 %vm509_vm14, %v465_v13  ;;  %v1402_v13 = vpop.eup %1401 }
 0x1b5   :  { %1363 = vmatpush3.bf16.msra.mxu1 %v1360_v26  ;;  %1282 = vmatprep.mubr.msk.f32.mxu1 %vm509_vm14, %v495_v16  ;;  %1394 = vpush %v1402_v13 }
 0x1b6   :  { %1365 = vmatprep.subr.bf16.mxu1 %v1364_v39  ;;  %v701_v42 = vpop.permute.xlu0 %700 }
 0x1b7   :  { %v713_v45 = vsel %vm456_vm12, %v1720_v27, %v701_v42  ;;  %v848_v27 = vld [vmem:[%s1877_s2 + $0x150] sm:$0xff] }
 0x1b8   :  { %v1381_v54 = vpack.c.bf16 %v849_v53, %v848_v27 }
 0x1b9   :  { %1367 = vmatpush3.bf16.msra.mxu1 %v1364_v39 }
 0x1ba   :  { %1369 = vmatprep.subr.bf16.mxu1 %v1368_v34  ;;  %v703_v43 = vpop.permute.xlu1 %702  ;;  %v708_v44 = vpop.permute.xlu0 %707 }
 0x1bb   :  { %v715_v48 = vsel %vm461_vm13, %v713_v45, %v708_v44  ;;  %v714_v50 = vsel %vm456_vm12, %v1723_v35, %v703_v43  ;;  %v850_v35 = vld [vmem:[%s1877_s2 + $0x160] sm:$0xff]  ;;  %v1025_v43 = vld [vmem:[%s1877_s2 + $0x173] ss:$0 sm:$0xff]  ;;  %v1026_v45 = vld [vmem:[%s1877_s2 + $0x174] ss:$0 sm:$0xff] }
 0x1bc   :  { %v1384_v29 = vpack.c.bf16 %v851_v55, %v850_v35 }
 0x1bd   :  { %1371 = vmatpush3.bf16.msra.mxu1 %v1368_v34 }
 0x1be   :  { %1373 = vmatprep.subr.bf16.mxu1 %v1372_v56  ;;  %v710_v49 = vpop.permute.xlu1 %709 }
 0x1bf   :  { %v716_v52 = vsel %vm461_vm13, %v714_v50, %v710_v49 }
 0x1c1   :  { %1375 = vmatpush3.bf16.msra.mxu1 %v1372_v56 }
 0x1c2   :  { %1377 = vmatprep.subr.bf16.mxu1 %v1376_v41 }
 0x1c5   :  { %1379 = vmatpush3.bf16.msra.mxu1 %v1376_v41 }
 0x1c6   :  { %1380 = vmatprep.subr.bf16.mxu1 %v1405_v0 }
 0x1c8   :  { %1283 = vmatmul.mubr.msk.f32.vlgmr.msra.gmra.mrb[0].mxu1 %vm509_vm14, %v496_v23 }
 0x1c9   :  { %1285 = vmatprep.mubr.msk.f32.mxu1 %vm509_vm14, %v715_v48  ;;  %1382 = vmatpush3.bf16.msra.mxu1 %v1381_v54 }
 0x1ca   :  { %1383 = vmatprep.subr.bf16.mxu1 %v1405_v0  ;;  %v1021_v0 = vld [vmem:[%s1877_s2 + $0x171] ss:$0 sm:$0xff] }
 0x1cc   :  { %1286 = vmatmul.mubr.msk.f32.gmra.mrb[2].mxu1 %vm509_vm14, %v716_v52 }
 0x1cd   :  { %1296 = vmatprep.mubr.msk.f32.mxu1 %vm1406_vm0, %v1407_v4  ;;  %1385 = vmatpush3.bf16.msra.mxu1 %v1384_v29 }
 0x1e6   :  { %s1395_s28 = spop %1394 }
 0x1e7   :  { %v948_v46 = vstv %s1395_s28 }
 0x29b   :  { %v1284_v58 = vpop.f32.mrb[0].mxu1 }
 0x29c   :  { %v830_v60 = vadd.f32 %v1284_v58, %v1021_v0  ;;  %v801_v61 = vpop.f32.mrb[1].mxu1 }
 0x29d   :  { %v829_v20 = vadd.f32 %v1021_v0, %v801_v61 }
 0x29e   :  { %vm834_vm0 = vcmp.gt.f32.partialorder %v830_v60, 0.0  ;;  %v838_v62 = vmul.f32 0.2, %v830_v60 }
 0x29f   :  { %vm833_vm15 = vcmp.gt.f32.partialorder %v829_v20, 0.0  ;;  %v837_v63 = vmul.f32 0.2, %v829_v20  ;;  %v1287_v1 = vpop.f32.mrb[2].mxu1 }
 0x2a0   :  { %v842_v2 = vsel %vm834_vm0, %v830_v60, %v838_v62  ;;  %v832_v11 = vadd.f32 %v1287_v1, %v1021_v0  ;;  %v811_v3 = vpop.f32.mrb[3].mxu1 }
 0x2a1   :  { %v841_v5 = vsel %vm833_vm15, %v829_v20, %v837_v63  ;;  %v831_v6 = vadd.f32 %v1021_v0, %v811_v3 }
 0x2a2   :  { %v845_v8 = vmax.f32 %v841_v5, %v842_v2  ;;  %vm836_vm1 = vcmp.gt.f32.partialorder %v832_v11, 0.0  ;;  %v840_v9 = vmul.f32 0.2, %v832_v11 }
 0x2a3   :  { %vm835_vm2 = vcmp.gt.f32.partialorder %v831_v6, 0.0  ;;  %v839_v10 = vmul.f32 0.2, %v831_v6 }
 0x2a4   :  { %v844_v12 = vsel %vm836_vm1, %v832_v11, %v840_v9 }
 0x2a5   :  { %v843_v14 = vsel %vm835_vm2, %v831_v6, %v839_v10 }
 0x2a6   :  { %v846_v15 = vmax.f32 %v843_v14, %v844_v12 }
 0x2a8   :  { %v847_v16 = vmax.f32 %v845_v8, %v846_v15 }
 0x2aa   :  { %1297 = vmatmul.mubr.msk.f32.vlgmr.msra.gmra.mrb[4].mxu1 %vm456_vm12, %v847_v16 }
 0x37d   :  { %v926_v51 = vpop.f32.mrb[4].mxu1 }
 0x37e   :  { %v927_v21 = vadd.f32 %v1022_v47, %v926_v51  ;;  %v1298_v22 = vpop.f32.mrb[5].mxu1 }
 0x380   :  { %v941_v23 = vmul.f32 %v1024_v19, %v927_v21 }
 0x382   :  { %v942_v24 = vrot.slane %v941_v23, 4 }
 0x384   :  { %v943_v25 = vadd.f32 %v942_v24, %v941_v23 }
 0x386   :  { %v944_v32 = vrot.slane %v943_v25, 2 }
 0x388   :  { %v945_v59 = vadd.f32 %v944_v32, %v943_v25 }
 0x38a   :  { %v946_v26 = vrot.slane %v945_v59, 1 }
 0x38c   :  { %v947_v28 = vadd.f32 %v946_v26, %v945_v59 }
 0x38e   :  { %v949_v30 = vmul.f32 %v948_v46, %v947_v28 }
 0x390   :  { %v950_v39 = vsub.f32 %v927_v21, %v949_v30 }
 0x392   :  { %v951_v31 = vmul.f32 %v950_v39, %v950_v39 }
 0x394   :  { %v952_v33 = vmul.f32 %v1024_v19, %v951_v31 }
 0x396   :  { %v953_v34 = vrot.slane %v952_v33, 4 }
 0x398   :  { %v954_v36 = vadd.f32 %v953_v34, %v952_v33 }
 0x39a   :  { %v955_v37 = vrot.slane %v954_v36, 2 }
 0x39c   :  { %v956_v56 = vadd.f32 %v955_v37, %v954_v36 }
 0x39e   :  { %v957_v4 = vrot.slane %v956_v56, 1 }
 0x3a0   :  { %v958_v38 = vadd.f32 %v957_v4, %v956_v56 }
 0x3a2   :  { %v959_v40 = vmul.f32 %v958_v38, %v948_v46 }
 0x3a4   :  { %v960_v41 = vadd.f32 1e-05, %v959_v40 }
 0x3a6   :  { %1403 = vrsqrt.f32 %v960_v41 }
 0x3b0   :  { %v1404_v42 = vpop.eup %1403 }
 0x3b1   :  { %v962_v44 = vmul.f32 %v1404_v42, %v950_v39 }
 0x3b3   :  { %v968_v48 = vmul.f32 %v1025_v43, %v962_v44 }
 0x3b5   :  { %v974_v49 = vadd.f32 %v1026_v45, %v968_v48 }
 0x3b7   :  { %vm975_vm4 = vcmp.gt.f32.partialorder %v974_v49, 0.0  ;;  %v976_v50 = vmul.f32 0.2, %v974_v49 }
 0x3b9   :  { %v977_v52 = vsel %vm975_vm4, %v974_v49, %v976_v50 }
 0x3ba   :  { %978 = vst [vmem:[%s1880_s3] sm:$0xff] %v977_v52 }

</bundles_post_ra>
